<compile_context>
chip_gen: v5e
topology: v5e:2x2
jax: 0.10.0
libtpu: 0.0.40
codegen_flags: <defaults>
</compile_context>

<pallas_src>
import jax
import jax.numpy as jnp
from jax.experimental import pallas as pl
from jax.experimental.pallas import tpu as pltpu

LN_EPS = 1e-5  # nn.LayerNorm default eps


def stmoe_kernel(x_ref, w1_ref, gw_ref, wc_ref, bc_ref, out_ref):
    TB, T, S = x_ref.shape
    O = w1_ref.shape[1]

    # --- dimension_reducer: Conv1d(k=1) == per-timestep linear (bf16 MXU) ----
    x = x_ref[...]                                                    # (TB,T,S) bf16
    h = jnp.dot(x.reshape(TB * T, S), w1_ref[...],
                preferred_element_type=jnp.float32).reshape(TB, T, O)  # f32

    # --- LayerNorm(time) + TimeWeightedSum: single pass via moments ----------
    gw = gw_ref[...].astype(jnp.float32)                              # (T,1) = gamma*tw
    gw_sum = jnp.sum(gw)                                              # scalar
    s0 = jnp.sum(h, axis=1)                                           # (TB,O)
    s2 = jnp.sum(h * h, axis=1)                                       # (TB,O)
    sg = jnp.sum(h * gw[None, :, :], axis=1)                          # (TB,O)

    inv_t = jnp.float32(1.0 / T)
    mean = s0 * inv_t
    var = s2 * inv_t - mean * mean
    rstd = jax.lax.rsqrt(var + LN_EPS)
    z = (sg - gw_sum * mean) * rstd                                   # (TB,O) f32

    # --- classifier: Linear(output_dim, num_classes) (lane-padded to KP) -----
    out = jnp.dot(z.astype(wc_ref.dtype), wc_ref[...],
                  preferred_element_type=jnp.float32) \
        + bc_ref[...].astype(jnp.float32)                             # (TB,KP)
    out_ref[...] = out.astype(out_ref.dtype)


def _pick_tb(B, cap=512):
    """Largest divisor of B that is <= cap, a multiple of 8 (output-block
    sublane constraint), and leaves >= 2 grid steps (v7x megacore).
    Falls back to the whole batch (single grid step) for tiny B."""
    cands = [d for d in range(1, B + 1) if B % d == 0 and d <= cap]
    good = [d for d in cands if d % 8 == 0 and B // d >= 2]
    if good:
        return max(good)
    return B if B <= cap else max(cands)


def stmoe_forward(x, params, *, tb=None):
    B, T, S = x.shape
    O = params["w1"].shape[1]
    K = params["wc"].shape[1]

    tb = _pick_tb(B) if tb is None else tb
    assert B % tb == 0, "batch must be divisible by the batch tile"

    # --- wrapper-side constant folding (zero kernel cost) ---------------------
    # LayerNorm affine is per-time-step (shape (T,1), broadcast over channels),
    # so gamma folds into the time weights and beta folds into a scalar that is
    # absorbed by the classifier bias.
    gw = (params["gamma"] * params["tw"]).astype(jnp.float32)          # (T,1)
    beta_contrib = jnp.sum(params["beta"] * params["tw"])              # scalar
    bc_fold = params["bc"] + beta_contrib * jnp.sum(params["wc"], axis=0,
                                                    keepdims=True)     # (1,K)

    # --- lane-dense output: pad classifier to KP = ceil(K/128)*128 lanes ------
    KP = 128 * pl.cdiv(K, 128)
    wc_p = jnp.zeros((O, KP), jnp.bfloat16).at[:, :K].set(
        params["wc"].astype(jnp.bfloat16))
    bc_p = jnp.zeros((1, KP), jnp.float32).at[:, :K].set(
        bc_fold.astype(jnp.float32))

    # --- bf16 inputs for the MXU; HBM traffic halved ---------------------------
    x_bf = x.astype(jnp.bfloat16)
    w1_bf = params["w1"].astype(jnp.bfloat16)

    grid = (B // tb,)

    # --- VMEM footprint (double-buffered x/out + weights + f32 intermediates) --
    vmem_needed = (2 * tb * T * S * 2            # x, bf16, double-buffered
                   + S * O * 2 + O * KP * 2      # w1, wc (bf16)
                   + T * 4 + KP * 4              # gw, bc
                   + tb * T * O * 4              # h (f32)
                   + 6 * tb * O * 4              # moment / z temporaries
                   + 2 * tb * KP * 4)            # output, double-buffered
    vmem_limit = int(min(64 * 1024 * 1024, max(8 * 1024 * 1024, 4 * vmem_needed)))

    flops = 2 * B * T * S * O + 2 * B * O * KP + 6 * B * T * O
    bytes_accessed = (x_bf.size * 2 + w1_bf.size * 2 + gw.size * 4
                      + wc_p.size * 2 + bc_p.size * 4 + B * KP * 4)
    cost = pl.CostEstimate(flops=int(flops), transcendentals=int(B * O),
                           bytes_accessed=int(bytes_accessed))

    out = pl.pallas_call(
        stmoe_kernel,
        out_shape=jax.ShapeDtypeStruct((B, KP), jnp.float32),
        grid=grid,
        in_specs=[
            # batch-tiled input: DMA'd per grid step (double-buffered).
            # On v5e, if DMA is still exposed after enlarging tb, consider
            # pipeline_mode=pl.Buffered(3) here (sweep 2 vs 3).
            pl.BlockSpec((tb, T, S), lambda i: (i, 0, 0)),
            # weights: constant index_map -> VMEM-resident across grid steps
            pl.BlockSpec((S, O), lambda i: (0, 0)),
            pl.BlockSpec((T, 1), lambda i: (0, 0)),
            pl.BlockSpec((O, KP), lambda i: (0, 0)),
            pl.BlockSpec((1, KP), lambda i: (0, 0)),
        ],
        out_specs=pl.BlockSpec((tb, KP), lambda i: (i, 0)),
        compiler_params=pltpu.CompilerParams(
            dimension_semantics=("parallel",),   # >=2 grid steps -> both v7x TCs
            vmem_limit_bytes=vmem_limit,
        ),
        cost_estimate=cost,
    )(x_bf, w1_bf, gw, wc_p, bc_p)

    return out[:, :K]


def stmoe_reference(x, params):
    """Pure-JAX f32 reference mirroring the PyTorch forward (identity
    submodules), using the ORIGINAL (unfolded) parameters."""
    B, T, S = x.shape
    h = x.reshape(B * T, S) @ params["w1"] + params["b1"]
    h = h.reshape(B, T, -1)
    mean = jnp.mean(h, axis=1, keepdims=True)
    var = jnp.mean((h - mean) ** 2, axis=1, keepdims=True)
    hn = (h - mean) / jnp.sqrt(var + LN_EPS)
    hn = hn * params["gamma"][None, :, :] + params["beta"][None, :, :]
    z = jnp.sum(hn * params["tw"][None, :, :], axis=1)
    return z @ params["wc"] + params["bc"]


if __name__ == "__main__":
    # Small synthetic config: sensor_dim=8, time_dim=16,
    # out_channels=output_dim=32, num_classes=8, batch=16 (auto-tiled to 8 -> 2 steps).
    B, T, S, O, K = 16, 16, 8, 32, 8

    key = jax.random.PRNGKey(0)
    kx, kw1, kwc, kg, kb = jax.random.split(key, 5)

    x = jax.random.normal(kx, (B, T, S), dtype=jnp.float32)

    params = {
        # Conv1d(sensor_dim, out_channels, k=1) weight, stored transposed (S, O)
        "w1": jax.random.normal(kw1, (S, O), dtype=jnp.float32) * 0.1,
        "b1": jnp.full((1, O), 0.01, dtype=jnp.float32),  # reference-only (cancels in LN)
        # LayerNorm(time_dim) affine params, per-time-step, shape (T, 1)
        "gamma": 1.0 + 0.05 * jax.random.normal(kg, (T, 1), dtype=jnp.float32),
        "beta": 0.05 * jax.random.normal(kb, (T, 1), dtype=jnp.float32),
        # TimeWeightedSum: torch.linspace(1, 0, steps=time_window)
        "tw": jnp.linspace(1.0, 0.0, T, dtype=jnp.float32).reshape(T, 1),
        # classifier Linear(output_dim, num_classes), stored transposed (O, K)
        "wc": jax.random.normal(kwc, (O, K), dtype=jnp.float32) * 0.1,
        "bc": jnp.zeros((1, K), dtype=jnp.float32),
    }

    out = jax.block_until_ready(stmoe_forward(x, params))
    ref = stmoe_reference(x, params)
    assert out.shape == (B, K)
    # bf16 matmul inputs -> ~1e-2 relative error vs the f32 reference
    assert jnp.allclose(out, ref, atol=5e-2, rtol=5e-2), "mismatch vs reference"
    print("KERNEL_OK")
</pallas_src>

<mosaic_0001>
module attributes {stable_mosaic.version = 11 : i64} {
  func.func @stmoe_kernel(%arg0: i32, %arg1: memref<8x16x8xbf16, #tpu.memory_space<vmem>>, %arg2: memref<8x32xbf16, #tpu.memory_space<vmem>>, %arg3: memref<16x1xf32, #tpu.memory_space<vmem>>, %arg4: memref<32x128xbf16, #tpu.memory_space<vmem>>, %arg5: memref<1x128xf32, #tpu.memory_space<vmem>>, %arg6: memref<8x128xf32, #tpu.memory_space<vmem>>) attributes {dimension_semantics = [#tpu.dimension_semantics<parallel>], iteration_bounds = array<i64: 2>, scalar_prefetch = 0 : i64, scratch_operands = 0 : i64, tpu.core_type = #tpu.core_type<tc>, window_params = [{transform_indices = @transform_0, window_bounds = array<i64: 8, 16, 8>}, {pipeline_mode = #tpu.pipeline_mode<synchronous>, transform_indices = @transform_1, window_bounds = array<i64: 8, 32>}, {pipeline_mode = #tpu.pipeline_mode<synchronous>, transform_indices = @transform_2, window_bounds = array<i64: 16, 1>}, {pipeline_mode = #tpu.pipeline_mode<synchronous>, transform_indices = @transform_3, window_bounds = array<i64: 32, 128>}, {pipeline_mode = #tpu.pipeline_mode<synchronous>, transform_indices = @transform_4, window_bounds = array<i64: 1, 128>}, {transform_indices = @transform_5, window_bounds = array<i64: 8, 128>}]} {
    %c0 = arith.constant 0 : index
    %c0_0 = arith.constant 0 : index
    %c0_1 = arith.constant 0 : index
    %0 = vector.load %arg1[%c0, %c0_0, %c0_1] : memref<8x16x8xbf16, #tpu.memory_space<vmem>>, vector<8x16x8xbf16>
    %1 = vector.shape_cast %0 : vector<8x16x8xbf16> to vector<128x8xbf16>
    %c0_2 = arith.constant 0 : index
    %c0_3 = arith.constant 0 : index
    %2 = vector.load %arg2[%c0_2, %c0_3] : memref<8x32xbf16, #tpu.memory_space<vmem>>, vector<8x32xbf16>
    %cst = arith.constant dense<0.000000e+00> : vector<128x32xf32>
    %3 = tpu.matmul %1, %2, %cst {dimension_numbers = #tpu.dot_dimension_numbers<[1], [0], [0], [1], [0, 0, 1, 1], [], []>} : vector<128x8xbf16>, vector<8x32xbf16>, vector<128x32xf32> -> vector<128x32xf32>
    %4 = vector.shape_cast %3 : vector<128x32xf32> to vector<8x16x32xf32>
    %c0_4 = arith.constant 0 : index
    %c0_5 = arith.constant 0 : index
    %5 = vector.load %arg3[%c0_4, %c0_5] : memref<16x1xf32, #tpu.memory_space<vmem>>, vector<16x1xf32>
    %6 = vector.shape_cast %5 : vector<16x1xf32> to vector<1x16x1xf32>
    %cst_6 = arith.constant dense<0.000000e+00> : vector<1xf32>
    %7 = vector.multi_reduction <add>, %6, %cst_6 [1, 2] : vector<1x16x1xf32> to vector<1xf32>
    %8 = vector.shape_cast %7 : vector<1xf32> to vector<1x1x1xf32>
    %9 = vector.extract %8[0, 0, 0] : f32 from vector<1x1x1xf32>
    %cst_7 = arith.constant dense<0.000000e+00> : vector<8x32xf32>
    %10 = vector.multi_reduction <add>, %4, %cst_7 [1] : vector<8x16x32xf32> to vector<8x32xf32>
    %11 = arith.mulf %4, %4 : vector<8x16x32xf32>
    %cst_8 = arith.constant dense<0.000000e+00> : vector<8x32xf32>
    %12 = vector.multi_reduction <add>, %11, %cst_8 [1] : vector<8x16x32xf32> to vector<8x32xf32>
    %13 = vector.shape_cast %5 : vector<16x1xf32> to vector<1x16x1xf32>
    %14 = vector.broadcast %13 : vector<1x16x1xf32> to vector<8x16x32xf32>
    %15 = arith.mulf %4, %14 : vector<8x16x32xf32>
    %cst_9 = arith.constant dense<0.000000e+00> : vector<8x32xf32>
    %16 = vector.multi_reduction <add>, %15, %cst_9 [1] : vector<8x16x32xf32> to vector<8x32xf32>
    %cst_10 = arith.constant 6.250000e-02 : f32
    %17 = vector.broadcast %cst_10 : f32 to vector<8x32xf32>
    %18 = arith.mulf %10, %17 : vector<8x32xf32>
    %cst_11 = arith.constant 6.250000e-02 : f32
    %19 = vector.broadcast %cst_11 : f32 to vector<8x32xf32>
    %20 = arith.mulf %12, %19 : vector<8x32xf32>
    %21 = arith.mulf %18, %18 : vector<8x32xf32>
    %22 = arith.subf %20, %21 : vector<8x32xf32>
    %cst_12 = arith.constant 9.99999974E-6 : f32
    %23 = vector.broadcast %cst_12 : f32 to vector<8x32xf32>
    %24 = arith.addf %22, %23 : vector<8x32xf32>
    %25 = math.rsqrt %24 : vector<8x32xf32>
    %26 = vector.broadcast %9 : f32 to vector<8x32xf32>
    %27 = arith.mulf %26, %18 : vector<8x32xf32>
    %28 = arith.subf %16, %27 : vector<8x32xf32>
    %29 = arith.mulf %28, %25 : vector<8x32xf32>
    %30 = arith.truncf %29 : vector<8x32xf32> to vector<8x32xbf16>
    %c0_13 = arith.constant 0 : index
    %c0_14 = arith.constant 0 : index
    %31 = vector.load %arg4[%c0_13, %c0_14] : memref<32x128xbf16, #tpu.memory_space<vmem>>, vector<32x128xbf16>
    %cst_15 = arith.constant dense<0.000000e+00> : vector<8x128xf32>
    %32 = tpu.matmul %30, %31, %cst_15 {dimension_numbers = #tpu.dot_dimension_numbers<[1], [0], [0], [1], [0, 0, 1, 1], [], []>} : vector<8x32xbf16>, vector<32x128xbf16>, vector<8x128xf32> -> vector<8x128xf32>
    %c0_16 = arith.constant 0 : index
    %c0_17 = arith.constant 0 : index
    %33 = vector.load %arg5[%c0_16, %c0_17] : memref<1x128xf32, #tpu.memory_space<vmem>>, vector<1x128xf32>
    %34 = vector.broadcast %33 : vector<1x128xf32> to vector<8x128xf32>
    %35 = arith.addf %32, %34 : vector<8x128xf32>
    %c0_18 = arith.constant 0 : index
    %c0_19 = arith.constant 0 : index
    %36 = vector.load %arg6[%c0_18, %c0_19] : memref<8x128xf32, #tpu.memory_space<vmem>>, vector<8x128xf32>
    tpu.vector_store %arg6[%c0_18, %c0_19], %35 {strides = array<i32>} : memref<8x128xf32, #tpu.memory_space<vmem>>, vector<8x128xf32>,
    return
  }
  func.func @transform_0(%arg0: i32) -> (i32, i32, i32) {
    %c0_i32 = arith.constant 0 : i32
    %c0_i32_0 = arith.constant 0 : i32
    %c0_i32_1 = arith.constant 0 : i32
    return %arg0, %c0_i32, %c0_i32_0 : i32, i32, i32
  }
  func.func @transform_1(%arg0: i32) -> (i32, i32) {
    %c0_i32 = arith.constant 0 : i32
    %c0_i32_0 = arith.constant 0 : i32
    %c0_i32_1 = arith.constant 0 : i32
    return %c0_i32, %c0_i32_0 : i32, i32
  }
  func.func @transform_2(%arg0: i32) -> (i32, i32) {
    %c0_i32 = arith.constant 0 : i32
    %c0_i32_0 = arith.constant 0 : i32
    %c0_i32_1 = arith.constant 0 : i32
    return %c0_i32, %c0_i32_0 : i32, i32
  }
  func.func @transform_3(%arg0: i32) -> (i32, i32) {
    %c0_i32 = arith.constant 0 : i32
    %c0_i32_0 = arith.constant 0 : i32
    %c0_i32_1 = arith.constant 0 : i32
    return %c0_i32, %c0_i32_0 : i32, i32
  }
  func.func @transform_4(%arg0: i32) -> (i32, i32) {
    %c0_i32 = arith.constant 0 : i32
    %c0_i32_0 = arith.constant 0 : i32
    %c0_i32_1 = arith.constant 0 : i32
    return %c0_i32, %c0_i32_0 : i32, i32
  }
  func.func @transform_5(%arg0: i32) -> (i32, i32) {
    %c0_i32 = arith.constant 0 : i32
    %c0_i32_0 = arith.constant 0 : i32
    return %arg0, %c0_i32 : i32, i32
  }
}

</mosaic_0001>

<bundles_post_ra>
// kernel: tpu_custom_call.1
= control target key start
LH: loop header
LB: loop body
LE: loop exit
PB: predicated region body
PF: predicated region fallthrough
CT: control target
= control target key end

     0   :  { %10 = vsyncpa [#allocation3], 0  ;;  %s1609_s0 = inlined_call_operand.vmem [shape: bf16[16,16,8], index: 0, kind: input, shape index: {}]   ;;  %s1610_s1 = inlined_call_operand.vmem [shape: bf16[8,32], index: 1, kind: input, shape index: {}]   ;;  %s1611_s2 = inlined_call_operand.vmem [shape: f32[16,1], index: 2, kind: input, shape index: {}]   ;;  %s1612_s3 = inlined_call_operand.vmem [shape: bf16[32,128], index: 3, kind: input, shape index: {}]   ;;  %s1613_s4 = inlined_call_operand.vmem [shape: f32[1,128], index: 4, kind: input, shape index: {}]   ;;  %s1614_s5 = inlined_call_operand.hbm [shape: f32[16,128], index: 5, kind: output, shape index: {}]  }
   0x1   :  { %12 = vsyncpa [#allocation3 + $0x1], 0  ;;  %s1164_s18 = smov 0   ;;  %s1166_s19 = smov 0  }
   0x2   :  { %s1168_s20 = smov 0   ;;  %s1170_s21 = smov 0  }
   0x3 LB: > { %s933_s22 = sadd.s32 4294967295, %s1131_s21   ;;  %s934_s23 = sadd.s32 4294967294, %s1131_s21   ;;  %s1131_s21 = sphi %s1170_s21, %s1630_s21   ;;  %s1127_s20 = sphi %s1168_s20, %s1629_s20   ;;  %s1123_s19 = sphi %s1166_s19, %s1628_s19   ;;  %s1119_s18 = sphi %s1164_s18, %s1627_s18  }
   0x4   : > { %s1187_s24 = sadd.s32 1, %s1131_s21   ;;  %s135_s25 = sadd.s32 1, %s1127_s20 }
   0x5   : > { %s132_s26 = ssub.s32 %s1131_s21, %s1187_s24  ;;  %p145_p0 = scmp.ne.s32.totalorder %s1127_s20, %s1123_s19 }
   0x6   : > { %p133_p1 = scmp.eq.s32.totalorder %s132_s26, 0  ;;  %p146_p2 = scmp.eq.s32.totalorder %s933_s22, 1 }
   0x7   : > { %p151_p3 = scmp.ne.s32.totalorder %s1123_s19, %s1119_s18  ;;  %p152_p4 = scmp.eq.s32.totalorder %s934_s23, 1 }
   0x8   : > { %s1197_s27 = scalar_select %p133_p1, %s1127_s20, %s135_s25  }
   0x9   : > { %p1199_p5 = por %p146_p2, %p145_p0  ;;  %p1203_p6 = por %p152_p4, %p151_p3 }
   0xa   : > { %p937_p7 = scmp.ge.s32.totalorder %s1131_s21, 1  ;;  %p192_p8 = scmp.lt.s32.totalorder %s1131_s21, 3 }
   0xc   : > { %p193_p9 = pnand %p937_p7, %p192_p8 }
   0xd   : > { %s1218_s11 = sshll.u32 (!%p193_p9), %s933_s22, 3  ;;  %s218_s30 = sand.u32 (!%p193_p9), 1, %s1123_s19  }
   0xe   : > { %196 = sbr.rel (%p193_p9) target bundleno = 403 (0x193), region = 40  ;;  %p222_p10 = scmp.lt.s32.totalorder (!%p193_p9), %s1218_s11, 15 }
   0xf   : > { %s938_s6 = sshll.u32 (!%p193_p9), %s218_s30, 3  ;;  %s870_s9 = scalar_lea.hbm (!%p193_p9), %s1614_s5, %s1218_s11 }
  0x10   : > { %s874_s15 = sshll.u32 (!%p193_p9), %s870_s9, 4  ;;  %s1089_s25 = scalar_lea.hbm (!%p193_p9), %s1614_s5, 16  ;;  %s875_s15 = int_to_ptr.hbm [resolvable:$true] %s874_s15 }
  0x11   : > { %s1083_s17 = sshra.s32 (!%p193_p9), %s875_s15, 4  ;;  %s1084_s17 = int_to_ptr.hbm [resolvable:$true] %s1083_s17 }
  0x12   : > { %s1085_s22 = scalar_lea.hbm (!%p193_p9), %s1084_s17, 8  ;;  %p1090_p0 = scmp.lt.s32.totalorder (!%p193_p9), %s1084_s17, %s1614_s5 }
  0x13   : > { %v364_v0 = vld [vmem:[%s1611_s2] sm:$0xff]  ;;  %v365_v1 = vld [vmem:[%s1611_s2 + $0x8] sm:$0xff]  ;;  %vm366_vm0 = vcmask 7168   ;;  %vm311_vm1 = vcmask 1043456   ;;  %v1133_v7 = vmov 0   ;;  %s223_s12 = scalar_select %p222_p10, %s1218_s11, 15 }
  0x14   : > { %v245_v2 = vld [vmem:[%s1610_s1] sm:$0xf]  ;;  %v367_v3 = vsel %vm366_vm0, %v364_v0, 0.0  ;;  %v368_v4 = vsel %vm366_vm0, %v365_v1, 0.0  ;;  %1050 = vset.pattern.permute.xlu0 %v1133_v7  ;;  %1051 = vset.pattern.permute.xlu1 %v1133_v7  ;;  %vm286_vm2 = vcmask 64512   ;;  %vm379_vm3 = vcmask 261120   ;;  %p1086_p11 = scmp.ne.s32.totalorder %s1084_s17, %s1085_s22  ;;  %p1091_p1 = scmp.lt.s32.totalorder %s1089_s25, %s1085_s22 }
  0x15   : > { %v313_v5 = vsel %vm311_vm1, %v245_v2, 0  ;;  %v369_v6 = vadd.f32 %v368_v4, %v367_v3  ;;  %547 = vperm.xlu1 %1051, %v365_v1   ;;  %s995_s13 = sshll.u32 %s223_s12, 3 }
  0x16   : > { %322 = vmatpush.bf16.msra.mxu0 %v313_v5  ;;  %1006 = vmatpush.bf16.msra.mxu2 %v313_v5  ;;  %s226_s16 = scalar_lea.vmem %s1609_s0, %s995_s13  ;;  %s220_s13 = scalar_lea.vmem [#allocation2], %s938_s6 }
  0x17   : > { %1007 = vmatpush.bf16.msra.mxu3 %v313_v5  ;;  %370 = vadd.xlane.f32.xlu0 %v369_v6  ;;  %v996_v8 = vld [vmem:[%s226_s16] sm:$0xff]  ;;  %v999_v9 = vld [vmem:[%s226_s16 + $0x18] sm:$0xff]  ;;  %v1002_v10 = vld [vmem:[%s226_s16 + $0x30] sm:$0xff]  ;;  %s872_s14 = sshll.u32 %s220_s13, 4  ;;  %p1087_p12 = pnand %p1086_p11, %p1199_p5  ;;  %s873_s14 = int_to_ptr.vmem [resolvable:$true] %s872_s14 }
  0x18   : > { %v997_v11 = vld [vmem:[%s226_s16 + $0x8] sm:$0xff]  ;;  %v1000_v12 = vld [vmem:[%s226_s16 + $0x20] sm:$0xff]  ;;  %v1003_v13 = vld [vmem:[%s226_s16 + $0x38] sm:$0xff]  ;;  %p1092_p2 = por %p1091_p1, %p1090_p0 }
  0x19   : > { %974 = vmatmul.msk.bf16.vlgmr.msra.gmra.mxu0 %vm286_vm2, %v996_v8  ;;  %977 = vmatmul.msk.bf16.vlgmr.msra.gmra.mxu2 %vm286_vm2, %v999_v9  ;;  %v998_v14 = vld [vmem:[%s226_s16 + $0x10] sm:$0xff]  ;;  %v1001_v15 = vld [vmem:[%s226_s16 + $0x28] sm:$0xff]  ;;  %s860_s16 = scalar_lea.sflag [#allocation3], %s218_s30  ;;  %p1088_p13 = pneg %p1087_p12 }
  0x1a   : > { %980 = vmatmul.msk.bf16.vlgmr.msra.gmra.mxu3 %vm286_vm2, %v1002_v10 }
  0x1b   : > { %p1093_p3 = pnand %p1092_p2, %p1088_p13 }
  0x29   : > { %975 = vmatmul.msk.bf16.gmra.mxu0 %vm286_vm2, %v997_v11  ;;  %978 = vmatmul.msk.bf16.gmra.mxu2 %vm286_vm2, %v1000_v12 }
  0x2a   : > { %981 = vmatmul.msk.bf16.gmra.mxu3 %vm286_vm2, %v1003_v13 }
  0x2b   : > { %542 = vperm.xlu0 %1050, %v364_v0  }
  0x39   : > { %976 = vmatmul.msk.bf16.gmra.mxu0 %vm286_vm2, %v998_v14  ;;  %979 = vmatmul.msk.bf16.gmra.mxu2 %vm286_vm2, %v1001_v15 }
  0x87   : > { %v1237_v28 = vpop.permute.xlu1 %547 }
  0x8a   : > { %v371_v16 = vpop.xlane.xlu0 %370 }
  0x8b   : > { %v372_v17 = vrot.slane %v371_v16, 4 }
  0x8d   : > { %v373_v18 = vadd.f32 %v372_v17, %v371_v16 }
  0x8f   : > { %v374_v19 = vrot.slane %v373_v18, 2 }
  0x91   : > { %v375_v20 = vadd.f32 %v374_v19, %v373_v18 }
  0x93   : > { %v376_v21 = vrot.slane %v375_v20, 1 }
  0x95   : > { %v377_v22 = vadd.f32 %v376_v21, %v375_v20 }
  0x96   : > { %v324_v23 = vpop.f32.mrf.mxu0 }
  0x97   : > { %1008 = vpush %v377_v22  ;;  %v452_v26 = vmul.f32 %v324_v23, %v324_v23  ;;  %v380_v30 = vsel %vm379_vm3, %v324_v23, 0.0 }
  0x99   : > { %v468_v36 = vsel %vm379_vm3, %v452_v26, 0.0 }
  0x9c   : > { %v339_v25 = vpop.f32.mrf.mxu2 }
  0x9d   : > { %v1233_v24 = vpop.permute.xlu0 %542  ;;  %v1235_v27 = vpop.f32.mrf.mxu3  ;;  %v458_v37 = vmul.f32 %v339_v25, %v339_v25  ;;  %v407_v41 = vsel %vm379_vm3, %v339_v25, 0.0 }
  0x9e   : > { %v326_v29 = vpop.f32.mrf.mxu0  ;;  %v550_v33 = vmul.f32 %v1233_v24, %v324_v23  ;;  %v434_v43 = vsel %vm379_vm3, %v1235_v27, 0.0  ;;  %v464_v49 = vmul.f32 %v1235_v27, %v1235_v27  ;;  %v556_v8 = vmul.f32 %v1233_v24, %v339_v25 }
  0x9f   : > { %v381_v31 = vsel %vm379_vm3, %v326_v29, 0.0  ;;  %v453_v32 = vmul.f32 %v326_v29, %v326_v29  ;;  %v551_v35 = vmul.f32 %v1237_v28, %v326_v29  ;;  %v495_v48 = vsel %vm379_vm3, %v458_v37, 0.0 }
  0xa0   : > { %v382_v34 = vadd.f32 %v381_v31, %v380_v30  ;;  %v566_v42 = vsel %vm379_vm3, %v550_v33, 0.0  ;;  %v522_v1 = vsel %vm379_vm3, %v464_v49, 0.0  ;;  %v593_v20 = vsel %vm379_vm3, %v556_v8, 0.0 }
  0xa1   : > { %v469_v38 = vsel %vm379_vm3, %v453_v32, 0.0  ;;  %v567_v46 = vsel %vm379_vm3, %v551_v35, 0.0 }
  0xa2   : > { %v383_v39 = vrot.slane %v382_v34, 4  ;;  %v470_v40 = vadd.f32 %v469_v38, %v468_v36  ;;  %v568_v57 = vadd.f32 %v567_v46, %v566_v42  ;;  %v562_v42 = vmul.f32 %v1233_v24, %v1235_v27 }
  0xa4   : > { %v384_v44 = vadd.f32 %v383_v39, %v382_v34  ;;  %v471_v45 = vrot.slane %v470_v40, 4  ;;  %v341_v47 = vpop.f32.mrf.mxu2  ;;  %v569_v10 = vrot.slane %v568_v57, 4 }
  0xa5   : > { %v408_v50 = vsel %vm379_vm3, %v341_v47, 0.0  ;;  %v459_v51 = vmul.f32 %v341_v47, %v341_v47  ;;  %v356_v52 = vpop.f32.mrf.mxu3  ;;  %v557_v59 = vmul.f32 %v1237_v28, %v341_v47 }
  0xa6   : > { %v385_v53 = vrot.slane %v384_v44, 2  ;;  %v472_v54 = vadd.f32 %v471_v45, %v470_v40  ;;  %v409_v55 = vadd.f32 %v408_v50, %v407_v41  ;;  %v435_v56 = vsel %vm379_vm3, %v356_v52, 0.0  ;;  %v1262_v21 = vpop.f32.mrf.mxu0 }
  0xa7   : > { %v496_v58 = vsel %vm379_vm3, %v459_v51, 0.0  ;;  %v436_v60 = vadd.f32 %v435_v56, %v434_v43  ;;  %v465_v3 = vmul.f32 %v356_v52, %v356_v52  ;;  %v594_v13 = vsel %vm379_vm3, %v557_v59, 0.0 }
  0xa8   : > { %v386_v61 = vadd.f32 %v385_v53, %v384_v44  ;;  %v473_v62 = vrot.slane %v472_v54, 2  ;;  %v410_v63 = vrot.slane %v409_v55, 4  ;;  %v497_v0 = vadd.f32 %v496_v58, %v495_v48 }
  0xa9   : > { %v437_v2 = vrot.slane %v436_v60, 4  ;;  %v523_v9 = vsel %vm379_vm3, %v465_v3, 0.0  ;;  %v570_v22 = vadd.f32 %v569_v10, %v568_v57  ;;  %v595_v23 = vadd.f32 %v594_v13, %v593_v20 }
  0xaa   : > { %v387_v4 = vrot.slane %v386_v61, 1  ;;  %v474_v5 = vadd.f32 %v473_v62, %v472_v54  ;;  %v411_v6 = vadd.f32 %v410_v63, %v409_v55  ;;  %v498_v7 = vrot.slane %v497_v0, 4 }
  0xab   : > { %v438_v16 = vadd.f32 %v437_v2, %v436_v60  ;;  %v524_v17 = vadd.f32 %v523_v9, %v522_v1  ;;  %v571_v34 = vrot.slane %v570_v22, 2  ;;  %v596_v35 = vrot.slane %v595_v23, 4 }
  0xac   : > { %v412_v11 = vrot.slane %v411_v6, 2  ;;  %v499_v12 = vadd.f32 %v498_v7, %v497_v0  ;;  %v388_v14 = vadd.f32 %v387_v4, %v386_v61  ;;  %v475_v15 = vrot.slane %v474_v5, 1  ;;  %v1266_v33 = vpop.f32.mrf.mxu2 }
  0xad   : > { %v439_v29 = vrot.slane %v438_v16, 2  ;;  %v525_v30 = vrot.slane %v524_v17, 4  ;;  %v572_v43 = vadd.f32 %v571_v34, %v570_v22  ;;  %v597_v44 = vadd.f32 %v596_v35, %v595_v23  ;;  %v1280_v55 = vpop.f32.mrf.mxu3 }
  0xae   : > { %v413_v18 = vadd.f32 %v412_v11, %v411_v6  ;;  %v500_v19 = vrot.slane %v499_v12, 2  ;;  %v476_v25 = vadd.f32 %v475_v15, %v474_v5  ;;  %v1264_v26 = vmul.f32 0.0625, %v388_v14  ;;  %v1273_v49 = vpop.f32.mrf.mxu0 }
  0xaf   : > { %v440_v38 = vadd.f32 %v439_v29, %v438_v16  ;;  %v526_v39 = vadd.f32 %v525_v30, %v524_v17  ;;  %v563_v45 = vmul.f32 %v1237_v28, %v356_v52  ;;  %v620_v53 = vsel %vm379_vm3, %v562_v42, 0.0 }
  0xb0   : > { %v414_v31 = vrot.slane %v413_v18, 1  ;;  %v501_v32 = vadd.f32 %v500_v19, %v499_v12  ;;  %v646_v36 = vmul.f32 0.0625, %v476_v25  ;;  %v654_v37 = vmul.f32 %v1264_v26, %v1264_v26 }
  0xb1   : > { %v441_v47 = vrot.slane %v440_v38, 1  ;;  %v527_v48 = vrot.slane %v526_v39, 2  ;;  %v454_v54 = vmul.f32 %v1262_v21, %v1262_v21  ;;  %v573_v27 = vrot.slane %v572_v43, 1 }
  0xb2   : > { %v415_v40 = vadd.f32 %v414_v31, %v413_v18  ;;  %v502_v41 = vrot.slane %v501_v32, 1  ;;  %v662_v46 = vsub.f32 %v646_v36, %v654_v37  ;;  %v598_v56 = vrot.slane %v597_v44, 2 }
  0xb3   : > { %v621_v57 = vsel %vm379_vm3, %v563_v45, 0.0  ;;  %v390_v52 = vsel %vm379_vm3, %v1273_v49, 0.0  ;;  %v442_v60 = vadd.f32 %v441_v47, %v440_v38  ;;  %v528_v61 = vadd.f32 %v527_v48, %v526_v39 }
  0xb4   : > { %v503_v50 = vadd.f32 %v502_v41, %v501_v32  ;;  %v1275_v51 = vmul.f32 0.0625, %v415_v40  ;;  %v1285_v58 = vpop.f32.mrf.mxu2  ;;  %v1287_v59 = vadd.f32 1e-05, %v662_v46  ;;  %v389_v62 = vsel %vm379_vm3, %v1262_v21, 0.0 }
  0xb5   : > { %v391_v1 = vadd.f32 %v390_v52, %v389_v62  ;;  %v455_v2 = vmul.f32 %v1273_v49, %v1273_v49  ;;  %v622_v3 = vadd.f32 %v621_v57, %v620_v53  ;;  %v477_v4 = vsel %vm379_vm3, %v454_v54, 0.0  ;;  %v1315_v36 = vpop.f32.mrf.mxu3 }
  0xb6   : > { %v649_v63 = vmul.f32 0.0625, %v503_v50  ;;  %v657_v0 = vmul.f32 %v1275_v51, %v1275_v51  ;;  %v416_v5 = vsel %vm379_vm3, %v1266_v33, 0.0  ;;  %v417_v6 = vsel %vm379_vm3, %v1285_v58, 0.0 }
  0xb7   : > { %v460_v7 = vmul.f32 %v1266_v33, %v1266_v33  ;;  %v392_v8 = vrot.slane %v391_v1, 4  ;;  %v478_v9 = vsel %vm379_vm3, %v455_v2, 0.0  ;;  %v418_v10 = vadd.f32 %v417_v6, %v416_v5 }
  0xb8   : > { %v1303_v11 = vadd.f32 %v598_v56, %v597_v44  ;;  %v529_v12 = vrot.slane %v528_v61, 1  ;;  %v1305_v13 = vmul.f32 0.0625, %v442_v60  ;;  %v479_v14 = vadd.f32 %v478_v9, %v477_v4 }
  0xb9   : > { %v665_v15 = vsub.f32 %v649_v63, %v657_v0  ;;  %v393_v16 = vadd.f32 %v392_v8, %v391_v1  ;;  %v419_v17 = vrot.slane %v418_v10, 4  ;;  %v461_v18 = vmul.f32 %v1285_v58, %v1285_v58  ;;  %v1336_v1 = vpop.f32.mrf.mxu0 }
  0xba   : > { %v1309_v19 = vadd.f32 %v573_v27, %v572_v43  ;;  %1053 = vrsqrt.f32 %v1287_v59  ;;  %v623_v20 = vrot.slane %v622_v3, 4  ;;  %v480_v22 = vrot.slane %v479_v14, 4 }
  0xbb   : > { %v504_v23 = vsel %vm379_vm3, %v460_v7, 0.0  ;;  %v394_v25 = vrot.slane %v393_v16, 2  ;;  %v420_v29 = vadd.f32 %v419_v17, %v418_v10  ;;  %v505_v30 = vsel %vm379_vm3, %v461_v18, 0.0 }
  0xbc   : > { %v600_v31 = vrot.slane %v1303_v11, 1  ;;  %v530_v32 = vadd.f32 %v529_v12, %v528_v61  ;;  %v481_v34 = vadd.f32 %v480_v22, %v479_v14  ;;  %v506_v35 = vadd.f32 %v505_v30, %v504_v23  ;;  %v1347_v14 = vpop.f32.mrf.mxu2 }
  0xbd   : > { %v1317_v37 = vadd.f32 1e-05, %v665_v15  ;;  %v660_v38 = vmul.f32 %v1305_v13, %v1305_v13  ;;  %v395_v39 = vadd.f32 %v394_v25, %v393_v16  ;;  %v421_v40 = vrot.slane %v420_v29, 2 }
  0xbe   : > { %v624_v41 = vadd.f32 %v623_v20, %v622_v3  ;;  %v443_v42 = vsel %vm379_vm3, %v1280_v55, 0.0  ;;  %v482_v43 = vrot.slane %v481_v34, 2  ;;  %v507_v44 = vrot.slane %v506_v35, 4 }
  0xbf   : > { %v466_v45 = vmul.f32 %v1280_v55, %v1280_v55  ;;  %v396_v46 = vrot.slane %v395_v39, 1  ;;  %v422_v47 = vadd.f32 %v421_v40, %v420_v29  ;;  %v444_v48 = vsel %vm379_vm3, %v1315_v36, 0.0 }
  0xc0   : > { %v1327_v50 = vpop.eup %1053  ;;  %v652_v53 = vmul.f32 0.0625, %v530_v32  ;;  %v552_v54 = vmul.f32 %v1233_v24, %v1262_v21  ;;  %v483_v27 = vadd.f32 %v482_v43, %v481_v34  ;;  %v508_v56 = vadd.f32 %v507_v44, %v506_v35 }
  0xc1   : > { %1055 = vrsqrt.f32 %v1317_v37  ;;  %v397_v57 = vadd.f32 %v396_v46, %v395_v39  ;;  %v553_v52 = vmul.f32 %v1237_v28, %v1273_v49  ;;  %v423_v60 = vrot.slane %v422_v47, 1 }
  0xc2   : > { %v484_v61 = vrot.slane %v483_v27, 1  ;;  %v509_v62 = vrot.slane %v508_v56, 2  ;;  %v445_v63 = vadd.f32 %v444_v48, %v443_v42  ;;  %v467_v0 = vmul.f32 %v1315_v36, %v1315_v36 }
  0xc3   : > { %v679_v21 = vmul.f32 %v1327_v50, %v1287_v59  ;;  %v625_v2 = vrot.slane %v624_v41, 2  ;;  %v531_v3 = vsel %vm379_vm3, %v466_v45, 0.0  ;;  %v1341_v4 = vmul.f32 0.0625, %v397_v57 }
  0xc4   : > { %v485_v5 = vadd.f32 %v484_v61, %v483_v27  ;;  %v510_v6 = vadd.f32 %v509_v62, %v508_v56  ;;  %v446_v49 = vrot.slane %v445_v63, 4  ;;  %v532_v7 = vsel %vm379_vm3, %v467_v0, 0.0  ;;  %v336_v27 = vpop.f32.mrf.mxu0 }
  0xc5   : > { %v668_v8 = vsub.f32 %v652_v53, %v660_v38  ;;  %v576_v9 = vsel %vm379_vm3, %v553_v52, 0.0  ;;  %v655_v10 = vmul.f32 %v1341_v4, %v1341_v4  ;;  %v424_v12 = vadd.f32 %v423_v60, %v422_v47 }
  0xc6   : > { %v647_v15 = vmul.f32 0.0625, %v485_v5  ;;  %v511_v16 = vrot.slane %v510_v6, 1  ;;  %v447_v17 = vadd.f32 %v446_v49, %v445_v63  ;;  %v533_v18 = vadd.f32 %v532_v7, %v531_v3 }
  0xc7   : > { %v1349_v20 = vpop.eup %1055  ;;  %v1351_v22 = vadd.f32 %v625_v2, %v624_v41  ;;  %v575_v23 = vsel %vm379_vm3, %v552_v54, 0.0  ;;  %v558_v25 = vmul.f32 %v1233_v24, %v1266_v33  ;;  %v564_v29 = vmul.f32 %v1233_v24, %v1280_v55 }
  0xc8   : > { %v680_v30 = vmul.f32 %v1327_v50, %v679_v21  ;;  %v663_v32 = vsub.f32 %v647_v15, %v655_v10  ;;  %v448_v34 = vrot.slane %v447_v17, 2  ;;  %v534_v35 = vrot.slane %v533_v18, 4  ;;  %v351_v21 = vpop.f32.mrf.mxu2  ;;  %s1009_s26 = spop %1008 }
  0xc9   : > { %v1359_v38 = vadd.f32 1e-05, %v668_v8  ;;  %v577_v39 = vadd.f32 %v576_v9, %v575_v23  ;;  %v512_v40 = vadd.f32 %v511_v16, %v510_v6  ;;  %v1361_v42 = vmul.f32 0.0625, %v424_v12 }
  0xca   : > { %v709_v41 = vmul.f32 %v1349_v20, %v1317_v37  ;;  %v559_v33 = vmul.f32 %v1237_v28, %v1285_v58  ;;  %v449_v43 = vadd.f32 %v448_v34, %v447_v17  ;;  %v535_v44 = vadd.f32 %v534_v35, %v533_v18 }
  0xcb   : > { %v1370_v55 = vadd.f32 %v600_v31, %v1303_v11  ;;  %v627_v45 = vrot.slane %v1351_v22, 1  ;;  %v602_v46 = vsel %vm379_vm3, %v558_v25, 0.0  ;;  %v629_v47 = vsel %vm379_vm3, %v564_v29, 0.0 }
  0xcc   : > { %v1375_v48 = vmul.f32 0.5, %v680_v30  ;;  %v1377_v53 = vadd.f32 1e-05, %v663_v32  ;;  %v450_v54 = vrot.slane %v449_v43, 1  ;;  %v565_v58 = vmul.f32 %v1237_v28, %v1315_v36 }
  0xcd   : > { %1057 = vrsqrt.f32 %v1359_v38  ;;  %v650_v56 = vmul.f32 0.0625, %v512_v40  ;;  %v658_v11 = vmul.f32 %v1361_v42, %v1361_v42  ;;  %v536_v31 = vrot.slane %v535_v44, 2 }
  0xce   : > { %v1385_v57 = vmul.f32 %v1349_v20, %v709_v41  ;;  %v578_v52 = vrot.slane %v577_v39, 4  ;;  %v603_v60 = vsel %vm379_vm3, %v559_v33, 0.0  ;;  %v451_v61 = vadd.f32 %v450_v54, %v449_v43 }
  0xcf   : > { %v537_v62 = vadd.f32 %v536_v31, %v535_v44  ;;  %v456_v63 = vmul.f32 %v1336_v1, %v1336_v1  ;;  %v399_v36 = vsel %vm379_vm3, %v336_v27, 0.0  ;;  %v457_v0 = vmul.f32 %v336_v27, %v336_v27 }
  0xd0   : > { %1059 = vrsqrt.f32 %v1377_v53  ;;  %v630_v2 = vsel %vm379_vm3, %v565_v58, 0.0  ;;  %v1393_v3 = vmul.f32 0.0625, %v451_v61  ;;  %v398_v5 = vsel %vm379_vm3, %v1336_v1, 0.0 }
  0xd1   : > { %v604_v6 = vadd.f32 %v603_v60, %v602_v46  ;;  %v666_v49 = vsub.f32 %v650_v56, %v658_v11  ;;  %v538_v7 = vrot.slane %v537_v62, 1  ;;  %v400_v8 = vadd.f32 %v399_v36, %v398_v5 }
  0xd2   : > { %v554_v9 = vmul.f32 %v1233_v24, %v1336_v1  ;;  %v487_v10 = vsel %vm379_vm3, %v457_v0, 0.0  ;;  %v555_v12 = vmul.f32 %v1237_v28, %v336_v27  ;;  %v426_v15 = vsel %vm379_vm3, %v351_v21, 0.0 }
  0xd3   : > { %v1402_v16 = vpop.eup %1057  ;;  %v539_v17 = vadd.f32 %v538_v7, %v537_v62  ;;  %v631_v18 = vadd.f32 %v630_v2, %v629_v47  ;;  %v486_v23 = vsel %vm379_vm3, %v456_v63, 0.0  ;;  %v425_v25 = vsel %vm379_vm3, %v1347_v14, 0.0 }
  0xd4   : > { %v661_v29 = vmul.f32 %v1393_v3, %v1393_v3  ;;  %v401_v30 = vrot.slane %v400_v8, 4  ;;  %v488_v1 = vadd.f32 %v487_v10, %v486_v23  ;;  %v427_v32 = vadd.f32 %v426_v15, %v425_v25 }
  0xd5   : > { %v1409_v34 = vadd.f32 1e-05, %v666_v49  ;;  %v653_v35 = vmul.f32 0.0625, %v539_v17  ;;  %v462_v40 = vmul.f32 %v1347_v14, %v1347_v14  ;;  %v585_v41 = vsel %vm379_vm3, %v555_v12, 0.0  ;;  %v1005_v17 = vld [vmem:[%s1612_s3 + $0x8] sm:$0xff] }
  0xd6   : > { %v1414_v33 = vpop.eup %1059  ;;  %v402_v43 = vadd.f32 %v401_v30, %v400_v8  ;;  %v489_v44 = vrot.slane %v488_v1, 4  ;;  %v428_v46 = vrot.slane %v427_v32, 4  ;;  %v463_v47 = vmul.f32 %v351_v21, %v351_v21  ;;  %851 = vmatpush.bf16.msra.mxu1 %v1005_v17 }
  0xd7   : > { %v579_v54 = vadd.f32 %v578_v52, %v577_v39  ;;  %v605_v58 = vrot.slane %v604_v6, 4  ;;  %v632_v27 = vrot.slane %v631_v18, 4  ;;  %v584_v56 = vsel %vm379_vm3, %v554_v9, 0.0 }
  0xd8   : > { %v669_v11 = vsub.f32 %v653_v35, %v661_v29  ;;  %v403_v31 = vrot.slane %v402_v43, 2  ;;  %v490_v60 = vadd.f32 %v489_v44, %v488_v1  ;;  %v429_v61 = vadd.f32 %v428_v46, %v427_v32 }
  0xd9   : > { %v689_v62 = vmul.f32 %v1414_v33, %v1377_v53  ;;  %1061 = vrsqrt.f32 %v1409_v34  ;;  %v586_v63 = vadd.f32 %v585_v41, %v584_v56  ;;  %v514_v36 = vsel %vm379_vm3, %v463_v47, 0.0 }
  0xda   : > { %v513_v0 = vsel %vm379_vm3, %v462_v40, 0.0  ;;  %v404_v2 = vadd.f32 %v403_v31, %v402_v43  ;;  %v491_v39 = vrot.slane %v490_v60, 2  ;;  %v430_v52 = vrot.slane %v429_v61, 2 }
  0xdb   : > { %v606_v5 = vadd.f32 %v605_v58, %v604_v6  ;;  %v633_v49 = vadd.f32 %v632_v27, %v631_v18  ;;  %v560_v7 = vmul.f32 %v1233_v24, %v1347_v14  ;;  %v515_v8 = vadd.f32 %v514_v36, %v513_v0  ;;  %v1004_v14 = vld [vmem:[%s1612_s3] sm:$0xff] }
  0xdc   : > { %v1424_v9 = vadd.f32 1e-05, %v669_v11  ;;  %v405_v10 = vrot.slane %v404_v2, 1  ;;  %v492_v12 = vadd.f32 %v491_v39, %v490_v60  ;;  %v431_v15 = vadd.f32 %v430_v52, %v429_v61  ;;  %852 = vmatpush.bf16.msra.mxu1 %v1004_v14 }
  0xdd   : > { %v690_v23 = vmul.f32 %v1414_v33, %v689_v62  ;;  %v587_v25 = vrot.slane %v586_v63, 4  ;;  %v516_v29 = vrot.slane %v515_v8, 4  ;;  %v561_v6 = vmul.f32 %v1237_v28, %v351_v21 }
  0xde   : > { %v580_v18 = vrot.slane %v579_v54, 2  ;;  %v406_v30 = vadd.f32 %v405_v10, %v404_v2  ;;  %v493_v1 = vrot.slane %v492_v12, 1  ;;  %v432_v24 = vrot.slane %v431_v15, 1 }
  0xdf   : > { %v1434_v32 = vpop.eup %1061  ;;  %v607_v35 = vrot.slane %v606_v5, 2  ;;  %v634_v40 = vrot.slane %v633_v49, 2  ;;  %v517_v41 = vadd.f32 %v516_v29, %v515_v8  ;;  %v612_v43 = vsel %vm379_vm3, %v561_v6, 0.0 }
  0xe0   : > { %1063 = vrsqrt.f32 %v1424_v9  ;;  %v494_v44 = vadd.f32 %v493_v1, %v492_v12  ;;  %v1438_v28 = vmul.f32 0.0625, %v406_v30  ;;  %v433_v21 = vadd.f32 %v432_v24, %v431_v15 }
  0xe1   : > { %v691_v46 = vmul.f32 0.5, %v690_v23  ;;  %v611_v47 = vsel %vm379_vm3, %v560_v7, 0.0  ;;  %v588_v58 = vadd.f32 %v587_v25, %v586_v63  ;;  %v518_v27 = vrot.slane %v517_v41, 2 }
  0xe2   : > { %v719_v56 = vmul.f32 %v1434_v32, %v1409_v34  ;;  %v648_v11 = vmul.f32 0.0625, %v494_v44  ;;  %v656_v31 = vmul.f32 %v1438_v28, %v1438_v28  ;;  %v613_v60 = vadd.f32 %v612_v43, %v611_v47 }
  0xe3   : > { %v1448_v61 = vadd.f32 %v627_v45, %v1351_v22  ;;  %v581_v62 = vadd.f32 %v580_v18, %v579_v54  ;;  %v519_v36 = vadd.f32 %v518_v27, %v517_v41  ;;  %v1450_v0 = vmul.f32 0.0625, %v433_v21 }
  0xe4   : > { %v682_v63 = vsub.f32 1.5, %v1375_v48  ;;  %vm685_vm4 = vweird.f32 %v1327_v50  ;;  %v608_v2 = vadd.f32 %v607_v35, %v606_v5  ;;  %v635_v39 = vadd.f32 %v634_v40, %v633_v49 }
  0xe5   : > { %v664_v52 = vsub.f32 %v648_v11, %v656_v31  ;;  %v1455_v7 = vmul.f32 0.5, %v1385_v57  ;;  %v692_v8 = vsub.f32 1.5, %v691_v46  ;;  %v589_v10 = vrot.slane %v588_v58, 2 }
  0xe6   : > { %v520_v12 = vrot.slane %v519_v36, 1  ;;  %v1457_v22 = vpop.eup %1063  ;;  %vm684_vm5 = vweird.f32 %v1287_v59  ;;  %v720_v45 = vmul.f32 %v1434_v32, %v719_v56  ;;  %v614_v48 = vrot.slane %v613_v60, 4 }
  0xe7   : > { %v1461_v54 = vadd.f32 1e-05, %v664_v52  ;;  %v1463_v15 = vstv %s1009_s26  ;;  %v739_v5 = vmul.f32 %v1402_v16, %v1359_v38  ;;  %v582_v49 = vrot.slane %v581_v62, 1  ;;  %vm686_vm12 = vmor %vm684_vm5, %vm685_vm4 }
  0xe8   : > { %v521_v57 = vadd.f32 %v520_v12, %v519_v36  ;;  %v659_v17 = vmul.f32 %v1450_v0, %v1450_v0  ;;  %v683_v23 = vmul.f32 %v1327_v50, %v682_v63  ;;  %v609_v25 = vrot.slane %v608_v2, 1 }
  0xe9   : > { %v636_v29 = vrot.slane %v635_v39, 1  ;;  %1065 = vrsqrt.f32 %v1461_v54  ;;  %v749_v6 = vmul.f32 %v1457_v22, %v1424_v9  ;;  %v590_v18 = vadd.f32 %v589_v10, %v588_v58 }
  0xea   : > { %v651_v30 = vmul.f32 0.0625, %v521_v57  ;;  %v759_v1 = vmul.f32 %v1463_v15, %v1264_v26  ;;  %vm715_vm6 = vweird.f32 %v1349_v20  ;;  %v693_v24 = vmul.f32 %v1414_v33, %v692_v8 }
  0xeb   : > { %vm695_vm7 = vweird.f32 %v1414_v33  ;;  %v721_v14 = vmul.f32 0.5, %v720_v45  ;;  %v615_v35 = vadd.f32 %v614_v48, %v613_v60  ;;  %v712_v40 = vsub.f32 1.5, %v1455_v7 }
  0xec   : > { %v583_v41 = vadd.f32 %v582_v49, %v581_v62  ;;  %v667_v43 = vsub.f32 %v651_v30, %v659_v17  ;;  %v740_v44 = vmul.f32 %v1402_v16, %v739_v5  ;;  %vm714_vm8 = vweird.f32 %v1317_v37 }
  0xed   : > { %vm694_vm9 = vweird.f32 %v1377_v53  ;;  %v1482_v21 = vadd.f32 %v609_v25, %v608_v2  ;;  %v1484_v26 = vadd.f32 %v636_v29, %v635_v39  ;;  %v760_v46 = vmul.f32 %v1463_v15, %v1341_v4  ;;  %vm1528_vm14 = vmor %vm714_vm8, %vm715_vm6 }
  0xee   : > { %vm1488_vm10 = vmor %vm694_vm9, %vm695_vm7  ;;  %v591_v58 = vrot.slane %v590_v18, 1  ;;  %v1492_v27 = vadd.f32 1e-05, %v667_v43  ;;  %v767_v56 = vsub.f32 %v1309_v19, %v759_v1  ;;  %v750_v11 = vmul.f32 %v1457_v22, %v749_v6 }
  0xef   : > { %v1066_v31 = vpop.eup %1065  ;;  %v722_v53 = vsub.f32 1.5, %v721_v14  ;;  %vm724_vm11 = vweird.f32 %v1409_v34  ;;  %v616_v60 = vrot.slane %v615_v35, 2  ;;  %v697_v4 = vsel %vm1488_vm10, %v1414_v33, %v693_v24 }
  0xf0   : > { %v761_v62 = vmul.f32 %v1463_v15, %v1438_v28  ;;  %v699_v19 = vmul.f32 %v1066_v31, %v1461_v54  ;;  %1067 = vrsqrt.f32 %v1492_v27  ;;  %v762_v36 = vmul.f32 %v1463_v15, %v1275_v51 }
  0xf1   : > { %v741_v63 = vmul.f32 0.5, %v740_v44  ;;  %v687_v2 = vsel %vm686_vm12, %v1327_v50, %v683_v23  ;;  %v763_v33 = vmul.f32 %v1463_v15, %v1361_v42  ;;  %v768_v39 = vsub.f32 %v583_v41, %v760_v46 }
  0xf2   : > { %v751_v28 = vmul.f32 0.5, %v750_v11  ;;  %v592_v52 = vadd.f32 %v591_v58, %v590_v18  ;;  %v700_v7 = vmul.f32 %v1066_v31, %v699_v19  ;;  %v765_v59 = vmul.f32 %v1463_v15, %v1305_v13 }
  0xf3   : > { %v775_v8 = vmul.f32 %v767_v56, %v687_v2  ;;  %v617_v10 = vadd.f32 %v616_v60, %v615_v35  ;;  %v1517_v12 = vmul.f32 %v1463_v15, %v1450_v0  ;;  %v776_v51 = vmul.f32 %v768_v39, %v697_v4 }
  0xf4   : > { %v713_v45 = vmul.f32 %v1349_v20, %v712_v40  ;;  %v701_v50 = vmul.f32 0.5, %v700_v7  ;;  %v769_v48 = vsub.f32 %v592_v52, %v761_v62  ;;  %v770_v42 = vsub.f32 %v1370_v55, %v762_v36 }
  0xf5   : > { %v742_v5 = vsub.f32 1.5, %v741_v63  ;;  %v771_v49 = vsub.f32 %v1482_v21, %v763_v33  ;;  %v723_v57 = vmul.f32 %v1434_v32, %v722_v53  ;;  %vm725_vm13 = vweird.f32 %v1434_v32 }
  0xf6   : > { %v752_v13 = vsub.f32 1.5, %v751_v28  ;;  %v1068_v17 = vpop.eup %1067  ;;  %v702_v23 = vsub.f32 1.5, %v701_v50  ;;  %vm704_vm15 = vweird.f32 %v1461_v54  ;;  %vm705_vm0 = vweird.f32 %v1066_v31  ;;  %vm1539_vm1 = vmor %vm724_vm11, %vm725_vm13 }
  0xf7   : > { %v783_v55 = vpack.c.bf16 %v775_v8, %v775_v8  ;;  %v618_v25 = vrot.slane %v617_v10, 1  ;;  %v729_v29 = vmul.f32 %v1068_v17, %v1492_v27  ;;  %v784_v6 = vpack.c.bf16 %v776_v51, %v776_v51  ;;  %vm706_vm5 = vmor %vm704_vm15, %vm705_vm0 }
  0xf8   : > { %v717_v18 = vsel %vm1528_vm14, %v1349_v20, %v713_v45  ;;  %v703_v30 = vmul.f32 %v1066_v31, %v702_v23  ;;  %v743_v1 = vmul.f32 %v1402_v16, %v742_v5  ;;  %vm744_vm2 = vweird.f32 %v1359_v38  ;;  %v1052_v45 = vld [vmem:[%s1613_s4] ss:$0 sm:$0xff] }
  0xf9   : > { %vm745_vm4 = vweird.f32 %v1402_v16  ;;  %v730_v54 = vmul.f32 %v1068_v17, %v729_v29  ;;  %v727_v24 = vsel %vm1539_vm1, %v1434_v32, %v723_v57  ;;  %v753_v20 = vmul.f32 %v1457_v22, %v752_v13 }
  0xfa   : > { %vm755_vm6 = vweird.f32 %v1457_v22  ;;  %v707_v34 = vsel %vm706_vm5, %v1066_v31, %v703_v30  ;;  %v807_v14 = vunpack.c.l.b16 %v783_v55  ;;  %v766_v35 = vmul.f32 %v1463_v15, %v1393_v3  ;;  %vm1553_vm7 = vmor %vm744_vm2, %vm745_vm4 }
  0xfb   : > { %v778_v40 = vmul.f32 %v770_v42, %v717_v18  ;;  %v731_v41 = vmul.f32 0.5, %v730_v54  ;;  %v777_v38 = vmul.f32 %v769_v48, %v707_v34  ;;  %v808_v43 = vunpack.c.l.b16 %v784_v6 }
  0xfc   : > { %vm754_vm8 = vweird.f32 %v1424_v9  ;;  %v747_v32 = vsel %vm1553_vm7, %v1402_v16, %v743_v1  ;;  %v773_v3 = vsub.f32 %v1448_v61, %v765_v59  ;;  %v779_v15 = vmul.f32 %v771_v49, %v727_v24 }
  0xfd   : > { %vm1561_vm9 = vmor %vm754_vm8, %vm755_vm6  ;;  %vm815_vm10 = vcmask 1041409   ;;  %v732_v46 = vsub.f32 1.5, %v731_v41  ;;  %v785_v47 = vpack.c.bf16 %v777_v38, %v777_v38  ;;  %vm735_vm11 = vweird.f32 %v1068_v17 }
  0xfe   : > { %v757_v58 = vsel %vm1561_vm9, %v1457_v22, %v753_v20  ;;  %v619_v9 = vadd.f32 %v618_v25, %v617_v10  ;;  %v774_v56 = vsub.f32 %v1484_v26, %v766_v35  ;;  %v786_v11 = vpack.c.bf16 %v778_v40, %v778_v40 }
  0xff   : > { %vm817_vm12 = vcmask 1042434   ;;  %vm734_vm13 = vweird.f32 %v1492_v27  ;;  %v733_v16 = vmul.f32 %v1068_v17, %v732_v46  ;;  %v781_v31 = vmul.f32 %v773_v3, %v747_v32 }
 0x100   : > { %v809_v53 = vunpack.c.l.b16 %v785_v47  ;;  %vm736_vm14 = vmor %vm734_vm13, %vm735_vm11  ;;  %v772_v61 = vsub.f32 %v619_v9, %v1517_v12  ;;  %v782_v60 = vmul.f32 %v774_v56, %v757_v58  ;;  %v816_v4 = vsel %vm815_vm10, %v808_v43, %v807_v14 }
 0x101   : > { %v737_v62 = vsel %vm736_vm14, %v1068_v17, %v733_v16  ;;  %v787_v19 = vpack.c.bf16 %v779_v15, %v779_v15  ;;  %vm819_vm15 = vcmask 1043459   ;;  %v810_v63 = vunpack.c.l.b16 %v786_v11 }
 0x102   : > { %v818_v36 = vsel %vm817_vm12, %v809_v53, %v816_v4  ;;  %v780_v22 = vmul.f32 %v772_v61, %v737_v62  ;;  %v789_v26 = vpack.c.bf16 %v781_v31, %v781_v31  ;;  %v790_v33 = vpack.c.bf16 %v782_v60, %v782_v60 }
 0x103   : > { %v820_v27 = vsel %vm819_vm15, %v810_v63, %v818_v36  ;;  %vm821_vm0 = vcmask 1044484   ;;  %v811_v39 = vunpack.c.l.b16 %v787_v19  ;;  %vm823_vm1 = vcmask 1045509  }
 0x104   : > { %v788_v2 = vpack.c.bf16 %v780_v22, %v780_v22  ;;  %vm825_vm2 = vcmask 1046534   ;;  %v813_v52 = vunpack.c.l.b16 %v789_v26  ;;  %vm827_vm4 = vcmask 1047559  }
 0x105   : > { %v822_v7 = vsel %vm821_vm0, %v811_v39, %v820_v27  ;;  %v814_v59 = vunpack.c.l.b16 %v790_v33 }
 0x106   : > { %v812_v28 = vunpack.c.l.b16 %v788_v2 }
 0x108   : > { %v824_v8 = vsel %vm823_vm1, %v812_v28, %v822_v7 }
 0x109   : > { %v826_v10 = vsel %vm825_vm2, %v813_v52, %v824_v8 }
 0x10a   : > { %v828_v12 = vsel %vm827_vm4, %v814_v59, %v826_v10 }
 0x10b   : > { %v829_v51 = vpack.c.b16 %v828_v12, %v828_v12 }
 0x10d   : > { %990 = vmatmul.msk.bf16.vlgmr.msra.gmra.mxu1 %vm379_vm3, %v829_v51 }
 0x18a   : > { %v854_v50 = vpop.f32.mrf.mxu1 }
 0x18b   : > { %v855_v48 = vadd.f32 %v1052_v45, %v854_v50 }
 0x18d   : > { %858 = vst [vmem:[%s220_s13] sm:$0xff] %v855_v48 }
 0x18e   : > { %1096 = shalt.err (!%p1093_p3)
}
 0x18f   : > { %1010 = dma.vmem_to_hbm [thread:$0]  (%p1199_p5), %s873_s14, 128, %s875_s15, %s860_s16  }
 0x192   : > { %v856_v42 = vpop.f32.mrf.mxu1 }
 0x193 PF: > { %p1016_p4 = scmp.ge.s32.totalorder %s1131_s21, 2  ;;  %s886_s30 = sand.u32 1, %s1119_s18  }
 0x194   : > { %s887_s7 = scalar_lea.sflag [#allocation3], %s886_s30 }
 0x195   : > { %p1013_p7 = pnand %p1016_p4, %p1203_p6 }
 0x197   : > { %p1014_p8 = pneg %p1013_p7 }
 0x199   : > { %1114 = dma.done.wait (%p1014_p8), %s887_s7, 128  }
 0x19a   : > { %1116 = vsyncadd (%p1014_p8), %s887_s7, 4294967168  ;;  %p15_p9 = scmp.ge.s32.totalorder %s1187_s24, 4   ;;  %s1627_s18 = smov %s1123_s19 }
 0x19b   : > { %s1628_s19 = smov %s1127_s20  ;;  %s1629_s20 = smov %s1197_s27 }
 0x19c   : > { %s1630_s21 = smov %s1187_s24  ;;  %17 = sbr.rel (!%p15_p9) target bundleno = 3 (0x3), region = 75 }
 0x1a1   :  { %893 = vsyncpa [#allocation3], 1 }
 0x1a2   :  { %895 = vsyncpa [#allocation3 + $0x1], 1 }

</bundles_post_ra>
